<compile_context>
chip_gen: v5e
topology: v5e:2x2
jax: 0.10.0
libtpu: 0.0.40
codegen_flags: <defaults>
</compile_context>

<pallas_src>
import jax
import jax.numpy as jnp
from jax.experimental import pallas as pl
from jax.experimental.pallas import tpu as pltpu

_LANES = 128
_SUBLANES = 8
_TILE_ROWS = 4096                 # (4096, 128) f32 = 2 MiB per input buffer
_NCORES = 2                       # leading "parallel" axis (v7x TC split)
_VMEM_LIMIT = 48 * 1024 * 1024    # explicit: > v5e 16 MiB default, < v7x 64 MiB physical


def _make_kernel(tile_rows, rows_total, steps_per_core, needs_mask):
    """Kernel with static tile/row geometry and mask-requirement closed over."""
    n_fold = tile_rows // _SUBLANES

    def accumulate(out_ref, inp, tgt):
        pos = tgt > jnp.float32(0.0)
        # |input*mask - target| == |input - target| where target > 0 else |target|.
        # (input needs no masking: the select discards it where pos is false.)
        abs_loss = jnp.abs(jnp.where(pos, inp - tgt, tgt))

        def fold(x):
            # (tile_rows, 128) -> (8, 128): tile-aligned reshape (free) followed
            # by vreg-wise VPU adds; no cross-lane work in the hot loop.
            return jnp.sum(x.reshape(n_fold, _SUBLANES, _LANES), axis=0)

        # Slice-adds into the resident accumulator (no (4,8,128) stack temp).
        out_ref[0] += fold(pos.astype(jnp.float32))
        out_ref[1] += fold((abs_loss > 2.0).astype(jnp.float32))
        out_ref[2] += fold((abs_loss > 3.0).astype(jnp.float32))
        out_ref[3] += fold((abs_loss > 5.0).astype(jnp.float32))

    def kernel(inp_ref, tgt_ref, out_ref):
        c = pl.program_id(0)   # "parallel" core axis
        i = pl.program_id(1)   # "arbitrary" reduction axis

        @pl.when(i == 0)
        def _init():
            out_ref[...] = jnp.zeros_like(out_ref)

        if not needs_mask:
            # Every block is full and in-bounds: zero masking overhead.
            accumulate(out_ref,
                       inp_ref[...].astype(jnp.float32),
                       tgt_ref[...].astype(jnp.float32))
        else:
            # Nominal (unclamped) first row of this block.
            row_start = (c * steps_per_core + i) * tile_rows
            rem = rows_total - row_start

            @pl.when(rem >= tile_rows)
            def _full_block():
                accumulate(out_ref,
                           inp_ref[...].astype(jnp.float32),
                           tgt_ref[...].astype(jnp.float32))

            @pl.when(rem < tile_rows)
            def _tail_block():
                # Ragged tail or clamped-duplicate block: mask target only.
                row_ids = jax.lax.broadcasted_iota(
                    jnp.int32, (tile_rows, _LANES), 0)
                tgt = jnp.where(row_ids < rem,
                                tgt_ref[...].astype(jnp.float32),
                                jnp.float32(0.0))
                accumulate(out_ref, inp_ref[...].astype(jnp.float32), tgt)

    return kernel


@jax.jit
def validation(inp, tgt):
    assert inp.shape == tgt.shape
    inp_flat = jnp.ravel(inp)
    tgt_flat = jnp.ravel(tgt)
    n_elem = inp_flat.shape[0]

    # Lane alignment (no-op when n_elem is already a multiple of 128).
    lane_pad = (-n_elem) % _LANES
    rows = (n_elem + lane_pad) // _LANES

    if rows >= _TILE_ROWS:
        tile_rows = _TILE_ROWS
        row_pad = 0
    else:
        # Small input: one block covering all rows, rounded up to a sublane multiple.
        row_pad = (-rows) % _SUBLANES
        tile_rows = rows + row_pad

    total_pad = lane_pad + row_pad * _LANES
    if total_pad:
        # Zero padding is neutral: tgt=0 -> mask false and abs_loss=0.
        # TODO(synk): unaligned n_elem still costs a full-array pad copy here.
        inp_flat = jnp.pad(inp_flat, (0, total_pad))
        tgt_flat = jnp.pad(tgt_flat, (0, total_pad))
    rows_p = (n_elem + total_pad) // _LANES
    inp2 = inp_flat.reshape(rows_p, _LANES)
    tgt2 = tgt_flat.reshape(rows_p, _LANES)

    row_blocks = pl.cdiv(rows_p, tile_rows)
    ncores = 1 if row_blocks == 1 else _NCORES   # single-block inputs: drop the core axis
    steps = pl.cdiv(row_blocks, ncores)
    last_block = row_blocks - 1

    ragged_tail = (rows_p % tile_rows) != 0
    clamped = (ncores * steps) != row_blocks
    needs_mask = ragged_tail or clamped

    if clamped:
        def in_map(c, i):
            # Excess iterations reload an in-bounds block (zeroed in-kernel).
            return (jnp.minimum(c * steps + i, last_block), 0)
    else:
        def in_map(c, i):
            return (c * steps + i, 0)

    kernel = _make_kernel(tile_rows, rows_p, steps, needs_mask)

    bytes_in = 2 * rows_p * _LANES * inp2.dtype.itemsize
    cost = pl.CostEstimate(
        flops=10 * rows_p * _LANES,
        transcendentals=0,
        bytes_accessed=bytes_in + ncores * 4 * _SUBLANES * _LANES * 4,
    )

    parts = pl.pallas_call(
        kernel,
        out_shape=jax.ShapeDtypeStruct((ncores, 4, _SUBLANES, _LANES), jnp.float32),
        grid_spec=pltpu.PrefetchScalarGridSpec(
            num_scalar_prefetch=0,
            grid=(ncores, steps),
            in_specs=[
                pl.BlockSpec((tile_rows, _LANES), in_map),
                pl.BlockSpec((tile_rows, _LANES), in_map),
            ],
            out_specs=pl.BlockSpec(
                (None, 4, _SUBLANES, _LANES), lambda c, i: (c, 0, 0, 0)
            ),
        ),
        compiler_params=pltpu.CompilerParams(
            dimension_semantics=("parallel", "arbitrary"),
            vmem_limit_bytes=_VMEM_LIMIT,
        ),
        cost_estimate=cost,
    )(inp2, tgt2)

    # Tiny final cross-core / cross-lane combine + normalize in plain JAX.
    # Counts accumulate in f32: exact up to 2^24 increments per (sublane,lane) cell.
    sums = jnp.sum(parts, axis=(0, 2, 3))   # [n, cnt>2, cnt>3, cnt>5]
    n = sums[0]                              # n == 0 -> inf/nan, matches reference
    return sums[1] / n, sums[2] / n, sums[3] / n


def _reference(inp, tgt):
    mask = (tgt > 0).astype(jnp.float32)
    n = jnp.sum(mask)
    inp = inp * mask
    abs_loss = jnp.abs(inp - tgt)
    e2 = jnp.sum((abs_loss > 2).astype(jnp.float32)) / n
    e3 = jnp.sum((abs_loss > 3).astype(jnp.float32)) / n
    e5 = jnp.sum((abs_loss > 5).astype(jnp.float32)) / n
    return e2, e3, e5


def _check(shape, key):
    k1, k2 = jax.random.split(key)
    inp = 4.0 * jax.random.normal(k1, shape, dtype=jnp.float32)
    tgt = 4.0 * jax.random.normal(k2, shape, dtype=jnp.float32)
    e2, e3, e5 = validation(inp, tgt)
    jax.block_until_ready((e2, e3, e5))
    r2, r3, r5 = _reference(inp, tgt)
    assert jnp.allclose(e2, r2, rtol=1e-5, atol=1e-6)
    assert jnp.allclose(e3, r3, rtol=1e-5, atol=1e-6)
    assert jnp.allclose(e5, r5, rtol=1e-5, atol=1e-6)


if __name__ == "__main__":
    key = jax.random.PRNGKey(0)
    k0, k1, k2 = jax.random.split(key, 3)

    # Primary small NCHW example (Validation has no parameters).
    _check((2, 4, 16, 16), k0)
    # Unaligned total size -> exercises the minimal lane/sublane pad path.
    _check((2, 3, 25, 31), k1)
    # Multi-block + ragged last block + clamped duplicate -> exercises the
    # pl.when tail-mask branch and the 2-core grid split.
    _check((1, 2, 2100, 512), k2)

    print("KERNEL_OK")
</pallas_src>

<mosaic_0001>
module attributes {stable_mosaic.version = 11 : i64} {
  func.func @kernel(%arg0: i32, %arg1: i32, %arg2: memref<16x128xf32, #tpu.memory_space<vmem>>, %arg3: memref<16x128xf32, #tpu.memory_space<vmem>>, %arg4: memref<1x4x8x128xf32, #tpu.memory_space<vmem>>) attributes {dimension_semantics = [#tpu.dimension_semantics<parallel>, #tpu.dimension_semantics<arbitrary>], iteration_bounds = array<i64: 1, 1>, scalar_prefetch = 0 : i64, scratch_operands = 0 : i64, tpu.core_type = #tpu.core_type<tc>, window_params = [{transform_indices = @transform_0, window_bounds = array<i64: 16, 128>}, {transform_indices = @transform_1, window_bounds = array<i64: 16, 128>}, {transform_indices = @transform_2, window_bounds = array<i64: 1, 4, 8, 128>}]} {
    %c0_i32 = arith.constant 0 : i32
    %0 = arith.cmpi eq, %arg1, %c0_i32 : i32
    %1 = arith.extui %0 : i1 to i32
    %c0_i32_0 = arith.constant 0 : i32
    %2 = arith.cmpi ne, %1, %c0_i32_0 : i32
    scf.if %2 {
      %cst_40 = arith.constant 0.000000e+00 : f32
      %56 = vector.broadcast %cst_40 : f32 to vector<4x8x128xf32>
      %c0_41 = arith.constant 0 : index
      %c0_42 = arith.constant 0 : index
      %c0_43 = arith.constant 0 : index
      %c0_44 = arith.constant 0 : index
      %57 = vector.load %arg4[%c0_41, %c0_42, %c0_43, %c0_44] : memref<1x4x8x128xf32, #tpu.memory_space<vmem>>, vector<1x4x8x128xf32>
      %58 = vector.shape_cast %57 : vector<1x4x8x128xf32> to vector<4x8x128xf32>
      %59 = vector.shape_cast %56 : vector<4x8x128xf32> to vector<1x4x8x128xf32>
      tpu.vector_store %arg4[%c0_41, %c0_42, %c0_43, %c0_44], %59 {strides = array<i32>} : memref<1x4x8x128xf32, #tpu.memory_space<vmem>>, vector<1x4x8x128xf32>,
    } else {
    }
    %c0 = arith.constant 0 : index
    %c0_1 = arith.constant 0 : index
    %3 = vector.load %arg2[%c0, %c0_1] : memref<16x128xf32, #tpu.memory_space<vmem>>, vector<16x128xf32>
    %c0_2 = arith.constant 0 : index
    %c0_3 = arith.constant 0 : index
    %4 = vector.load %arg3[%c0_2, %c0_3] : memref<16x128xf32, #tpu.memory_space<vmem>>, vector<16x128xf32>
    %cst = arith.constant 0.000000e+00 : f32
    %5 = vector.broadcast %cst : f32 to vector<16x128xf32>
    %6 = arith.cmpf ogt, %4, %5 : vector<16x128xf32>
    %7 = arith.subf %3, %4 : vector<16x128xf32>
    %8 = arith.select %6, %7, %4 : vector<16x128xi1>, vector<16x128xf32>
    %9 = math.absf %8 : vector<16x128xf32>
    %c0_4 = arith.constant 0 : index
    %c0_5 = arith.constant 0 : index
    %c0_6 = arith.constant 0 : index
    %c0_7 = arith.constant 0 : index
    %10 = vector.load %arg4[%c0_4, %c0_5, %c0_6, %c0_7] : memref<1x4x8x128xf32, #tpu.memory_space<vmem>>, vector<1x1x8x128xf32>
    %11 = vector.shape_cast %10 : vector<1x1x8x128xf32> to vector<8x128xf32>
    %12 = arith.extui %6 : vector<16x128xi1> to vector<16x128xi32>
    %13 = arith.sitofp %12 : vector<16x128xi32> to vector<16x128xf32>
    %14 = vector.shape_cast %13 : vector<16x128xf32> to vector<2x8x128xf32>
    %cst_8 = arith.constant dense<0.000000e+00> : vector<8x128xf32>
    %15 = vector.multi_reduction <add>, %14, %cst_8 [0] : vector<2x8x128xf32> to vector<8x128xf32>
    %16 = arith.addf %11, %15 : vector<8x128xf32>
    %c0_9 = arith.constant 0 : index
    %c0_10 = arith.constant 0 : index
    %c0_11 = arith.constant 0 : index
    %c0_12 = arith.constant 0 : index
    %17 = vector.load %arg4[%c0_9, %c0_10, %c0_11, %c0_12] : memref<1x4x8x128xf32, #tpu.memory_space<vmem>>, vector<1x1x8x128xf32>
    %18 = vector.shape_cast %17 : vector<1x1x8x128xf32> to vector<8x128xf32>
    %19 = vector.shape_cast %16 : vector<8x128xf32> to vector<1x1x8x128xf32>
    tpu.vector_store %arg4[%c0_9, %c0_10, %c0_11, %c0_12], %19 {strides = array<i32>} : memref<1x4x8x128xf32, #tpu.memory_space<vmem>>, vector<1x1x8x128xf32>,
    %c0_13 = arith.constant 0 : index
    %c1 = arith.constant 1 : index
    %c0_14 = arith.constant 0 : index
    %c0_15 = arith.constant 0 : index
    %20 = vector.load %arg4[%c0_13, %c1, %c0_14, %c0_15] : memref<1x4x8x128xf32, #tpu.memory_space<vmem>>, vector<1x1x8x128xf32>
    %21 = vector.shape_cast %20 : vector<1x1x8x128xf32> to vector<8x128xf32>
    %cst_16 = arith.constant 2.000000e+00 : f32
    %22 = vector.broadcast %cst_16 : f32 to vector<16x128xf32>
    %23 = arith.cmpf ogt, %9, %22 : vector<16x128xf32>
    %24 = arith.extui %23 : vector<16x128xi1> to vector<16x128xi32>
    %25 = arith.sitofp %24 : vector<16x128xi32> to vector<16x128xf32>
    %26 = vector.shape_cast %25 : vector<16x128xf32> to vector<2x8x128xf32>
    %cst_17 = arith.constant dense<0.000000e+00> : vector<8x128xf32>
    %27 = vector.multi_reduction <add>, %26, %cst_17 [0] : vector<2x8x128xf32> to vector<8x128xf32>
    %28 = arith.addf %21, %27 : vector<8x128xf32>
    %c0_18 = arith.constant 0 : index
    %c1_19 = arith.constant 1 : index
    %c0_20 = arith.constant 0 : index
    %c0_21 = arith.constant 0 : index
    %29 = vector.load %arg4[%c0_18, %c1_19, %c0_20, %c0_21] : memref<1x4x8x128xf32, #tpu.memory_space<vmem>>, vector<1x1x8x128xf32>
    %30 = vector.shape_cast %29 : vector<1x1x8x128xf32> to vector<8x128xf32>
    %31 = vector.shape_cast %28 : vector<8x128xf32> to vector<1x1x8x128xf32>
    tpu.vector_store %arg4[%c0_18, %c1_19, %c0_20, %c0_21], %31 {strides = array<i32>} : memref<1x4x8x128xf32, #tpu.memory_space<vmem>>, vector<1x1x8x128xf32>,
    %c0_22 = arith.constant 0 : index
    %c2 = arith.constant 2 : index
    %c0_23 = arith.constant 0 : index
    %c0_24 = arith.constant 0 : index
    %32 = vector.load %arg4[%c0_22, %c2, %c0_23, %c0_24] : memref<1x4x8x128xf32, #tpu.memory_space<vmem>>, vector<1x1x8x128xf32>
    %33 = vector.shape_cast %32 : vector<1x1x8x128xf32> to vector<8x128xf32>
    %cst_25 = arith.constant 3.000000e+00 : f32
    %34 = vector.broadcast %cst_25 : f32 to vector<16x128xf32>
    %35 = arith.cmpf ogt, %9, %34 : vector<16x128xf32>
    %36 = arith.extui %35 : vector<16x128xi1> to vector<16x128xi32>
    %37 = arith.sitofp %36 : vector<16x128xi32> to vector<16x128xf32>
    %38 = vector.shape_cast %37 : vector<16x128xf32> to vector<2x8x128xf32>
    %cst_26 = arith.constant dense<0.000000e+00> : vector<8x128xf32>
    %39 = vector.multi_reduction <add>, %38, %cst_26 [0] : vector<2x8x128xf32> to vector<8x128xf32>
    %40 = arith.addf %33, %39 : vector<8x128xf32>
    %c0_27 = arith.constant 0 : index
    %c2_28 = arith.constant 2 : index
    %c0_29 = arith.constant 0 : index
    %c0_30 = arith.constant 0 : index
    %41 = vector.load %arg4[%c0_27, %c2_28, %c0_29, %c0_30] : memref<1x4x8x128xf32, #tpu.memory_space<vmem>>, vector<1x1x8x128xf32>
    %42 = vector.shape_cast %41 : vector<1x1x8x128xf32> to vector<8x128xf32>
    %43 = vector.shape_cast %40 : vector<8x128xf32> to vector<1x1x8x128xf32>
    tpu.vector_store %arg4[%c0_27, %c2_28, %c0_29, %c0_30], %43 {strides = array<i32>} : memref<1x4x8x128xf32, #tpu.memory_space<vmem>>, vector<1x1x8x128xf32>,
    %c0_31 = arith.constant 0 : index
    %c3 = arith.constant 3 : index
    %c0_32 = arith.constant 0 : index
    %c0_33 = arith.constant 0 : index
    %44 = vector.load %arg4[%c0_31, %c3, %c0_32, %c0_33] : memref<1x4x8x128xf32, #tpu.memory_space<vmem>>, vector<1x1x8x128xf32>
    %45 = vector.shape_cast %44 : vector<1x1x8x128xf32> to vector<8x128xf32>
    %cst_34 = arith.constant 5.000000e+00 : f32
    %46 = vector.broadcast %cst_34 : f32 to vector<16x128xf32>
    %47 = arith.cmpf ogt, %9, %46 : vector<16x128xf32>
    %48 = arith.extui %47 : vector<16x128xi1> to vector<16x128xi32>
    %49 = arith.sitofp %48 : vector<16x128xi32> to vector<16x128xf32>
    %50 = vector.shape_cast %49 : vector<16x128xf32> to vector<2x8x128xf32>
    %cst_35 = arith.constant dense<0.000000e+00> : vector<8x128xf32>
    %51 = vector.multi_reduction <add>, %50, %cst_35 [0] : vector<2x8x128xf32> to vector<8x128xf32>
    %52 = arith.addf %45, %51 : vector<8x128xf32>
    %c0_36 = arith.constant 0 : index
    %c3_37 = arith.constant 3 : index
    %c0_38 = arith.constant 0 : index
    %c0_39 = arith.constant 0 : index
    %53 = vector.load %arg4[%c0_36, %c3_37, %c0_38, %c0_39] : memref<1x4x8x128xf32, #tpu.memory_space<vmem>>, vector<1x1x8x128xf32>
    %54 = vector.shape_cast %53 : vector<1x1x8x128xf32> to vector<8x128xf32>
    %55 = vector.shape_cast %52 : vector<8x128xf32> to vector<1x1x8x128xf32>
    tpu.vector_store %arg4[%c0_36, %c3_37, %c0_38, %c0_39], %55 {strides = array<i32>} : memref<1x4x8x128xf32, #tpu.memory_space<vmem>>, vector<1x1x8x128xf32>,
    return
  }
  func.func @transform_0(%arg0: i32, %arg1: i32) -> (i32, i32) {
    %c1_i32 = arith.constant 1 : i32
    %0 = arith.muli %arg0, %c1_i32 : i32
    %1 = arith.addi %0, %arg1 : i32
    %c0_i32 = arith.constant 0 : i32
    %c0_i32_0 = arith.constant 0 : i32
    return %1, %c0_i32 : i32, i32
  }
  func.func @transform_1(%arg0: i32, %arg1: i32) -> (i32, i32) {
    %c1_i32 = arith.constant 1 : i32
    %0 = arith.muli %arg0, %c1_i32 : i32
    %1 = arith.addi %0, %arg1 : i32
    %c0_i32 = arith.constant 0 : i32
    %c0_i32_0 = arith.constant 0 : i32
    return %1, %c0_i32 : i32, i32
  }
  func.func @transform_2(%arg0: i32, %arg1: i32) -> (i32, i32, i32, i32) {
    %c0_i32 = arith.constant 0 : i32
    %c0_i32_0 = arith.constant 0 : i32
    %c0_i32_1 = arith.constant 0 : i32
    %c0_i32_2 = arith.constant 0 : i32
    return %arg0, %c0_i32, %c0_i32_0, %c0_i32_1 : i32, i32, i32, i32
  }
}

</mosaic_0001>

<bundles_post_ra>
// kernel: validation.1
= control target key start
LH: loop header
LB: loop body
LE: loop exit
PB: predicated region body
PF: predicated region fallthrough
CT: control target
= control target key end

     0   :  { %v147_v6 = vmov 0.0   ;;  %s187_s0 = inlined_call_operand.vmem [shape: f32[16,128], index: 0, kind: input, shape index: {}]   ;;  %s188_s1 = inlined_call_operand.vmem [shape: f32[16,128], index: 1, kind: input, shape index: {}]   ;;  %s189_s2 = inlined_call_operand.vmem [shape: f32[1,4,8,128], index: 2, kind: output, shape index: {}]  }
   0x1   :  { %v63_v0 = vld [vmem:[%s187_s0] sm:$0xff]  ;;  %v64_v1 = vld [vmem:[%s187_s0 + $0x8] sm:$0xff] }
   0x2   :  { %v65_v2 = vld [vmem:[%s188_s1] sm:$0xff]  ;;  %v66_v3 = vld [vmem:[%s188_s1 + $0x8] sm:$0xff] }
   0x3   :  { %vm67_vm0 = vcmp.gt.f32.partialorder %v65_v2, 0.0  ;;  %v69_v4 = vsub.f32 %v63_v0, %v65_v2  ;;  %vm68_vm1 = vcmp.gt.f32.partialorder %v66_v3, 0.0  ;;  %v70_v5 = vsub.f32 %v64_v1, %v66_v3 }
   0x4   :  { %v132_v7 = vsel %vm67_vm0, 1.0, %v147_v6  ;;  %v133_v9 = vsel %vm68_vm1, 1.0, %v147_v6 }
   0x5   :  { %v71_v8 = vsel %vm67_vm0, %v69_v4, %v65_v2  ;;  %v72_v10 = vsel %vm68_vm1, %v70_v5, %v66_v3  ;;  %v80_v12 = vadd.f32 %v133_v9, %v132_v7 }
   0x6   :  { %v73_v11 = vand.u32 2147483647, %v71_v8  ;;  %v74_v13 = vand.u32 2147483647, %v72_v10 }
   0x7   :  { %82 = vst [vmem:[%s189_s2] sm:$0xff] %v80_v12 }
   0x8   :  { %vm85_vm2 = vcmp.gt.f32.partialorder %v73_v11, 2.0  ;;  %vm96_vm3 = vcmp.gt.f32.partialorder %v73_v11, 3.0  ;;  %vm107_vm4 = vcmp.gt.f32.partialorder %v73_v11, 5.0  ;;  %vm86_vm5 = vcmp.gt.f32.partialorder %v74_v13, 2.0 }
   0x9   :  { %v135_v14 = vsel %vm85_vm2, 1.0, %v147_v6  ;;  %vm97_vm6 = vcmp.gt.f32.partialorder %v74_v13, 3.0  ;;  %v139_v15 = vsel %vm96_vm3, 1.0, %v147_v6  ;;  %v136_v16 = vsel %vm86_vm5, 1.0, %v147_v6 }
   0xa   :  { %v140_v17 = vsel %vm97_vm6, 1.0, %v147_v6  ;;  %vm108_vm7 = vcmp.gt.f32.partialorder %v74_v13, 5.0  ;;  %v143_v18 = vsel %vm107_vm4, 1.0, %v147_v6  ;;  %v91_v19 = vadd.f32 %v136_v16, %v135_v14 }
   0xb   :  { %v102_v20 = vadd.f32 %v140_v17, %v139_v15  ;;  %v144_v21 = vsel %vm108_vm7, 1.0, %v147_v6 }
   0xc   :  { %v113_v22 = vadd.f32 %v144_v21, %v143_v18  ;;  %137 = vst [vmem:[%s189_s2 + $0x8] sm:$0xff] %v91_v19 }
   0xd   :  { %141 = vst [vmem:[%s189_s2 + $0x10] sm:$0xff] %v102_v20 }
   0xe   :  { %145 = vst [vmem:[%s189_s2 + $0x18] sm:$0xff] %v113_v22 }

</bundles_post_ra>
